<compile_context>
chip_gen: v7x
topology: tpu7x:2x2x1
jax: 0.10.0
libtpu: 0.0.40
codegen_flags: <defaults>
</compile_context>

<pallas_src>
import jax
import jax.numpy as jnp
from jax.experimental import pallas as pl
from jax.experimental.pallas import tpu as pltpu


# ---------------------------------------------------------------------------
# Kernel: one (tm, tn) output tile; grid axis 2 (F_in) is the MXU reduction.
# Both normalizations are folded into rank-1 *post*-matmul scalings, so neither
# the normalized input nor the weight-normed matrix is ever materialized:
#   y = (x @ v.T) * (1/||x||_row) * (g/||v||_row) + b
# ---------------------------------------------------------------------------
def _norm_linear_kernel(x_ref, w_ref, inv_xn_ref, scale_ref, b_ref, o_ref, acc_ref):
    k = pl.program_id(2)

    @pl.when(k == 0)
    def _init():
        acc_ref[...] = jnp.zeros_like(acc_ref)

    # Native-dtype operands (bf16-ready), f32 accumulation on the MXU.
    acc_ref[...] += jnp.dot(
        x_ref[...], w_ref[...], preferred_element_type=jnp.float32
    )

    @pl.when(k == pl.num_programs(2) - 1)
    def _finalize():
        inv_x_norm = inv_xn_ref[...]   # (tm, 1)  f32, precomputed in the wrapper
        scale = scale_ref[...]         # (1, tn)  f32, g / ||v||_row
        bias = b_ref[...]              # (1, tn)  f32
        o_ref[...] = (acc_ref[...] * inv_x_norm * scale + bias).astype(o_ref.dtype)


# ---------------------------------------------------------------------------
# Tiling helpers
# ---------------------------------------------------------------------------
def _round_up(x, m):
    return ((x + m - 1) // m) * m


def _sublane_align(dtype):
    """Second-minor alignment: 8 for 4-byte, 16 for 2-byte, 32 for 1-byte."""
    return max(8, 32 // jnp.dtype(dtype).itemsize)


def _pick_tile(dim, target, align):
    """Tile size (multiple of `align`) <= max(target, align).

    If `dim` does not divide evenly, the caller pads the array up to a tile
    multiple (keeps lane-dense stores and bounded VMEM instead of the old
    "fall back to the full dimension" behavior).
    """
    t = max(align, (target // align) * align)
    if dim <= t:
        return _round_up(dim, align)
    # Prefer an aligned divisor reasonably close to the target (no padding).
    for d in range(t, t // 2 - 1, -align):
        if dim % d == 0:
            return d
    return t


def _pad_to(a, shape):
    pads = [(0, s - d) for d, s in zip(a.shape, shape)]
    if any(p[1] for p in pads):
        return jnp.pad(a, pads)
    return a


def _vmem_limit_bytes(tm, tn, tk, mm_itemsize, out_itemsize):
    tile_bytes = (
        2 * tm * tk * mm_itemsize        # x tile, double-buffered
        + 2 * tk * tn * mm_itemsize      # w tile, double-buffered
        + 2 * tm * tn * out_itemsize     # output tile, double-buffered
        + tm * tn * 4                    # f32 accumulator scratch
        + 2 * (tm + 2 * tn) * 4          # inv_xn / scale / bias (tiny)
    )
    # ~1.4x headroom for compiler temporaries; clamp to v7x's 64 MiB per-TC VMEM.
    return int(min(tile_bytes * 1.4 + (8 << 20), 64 << 20))


# ---------------------------------------------------------------------------
# Weight preparation (do ONCE per set of static weights and cache the result).
# ---------------------------------------------------------------------------
def make_norm_linear_params(v, g, b, *, tn_target=1024, tk_target=512,
                            matmul_dtype=None):
    """v: [F_out, F_in], g: [F_out, 1] (or [F_out]), b: [F_out]."""
    F_out, F_in = v.shape
    mm_dtype = jnp.dtype(matmul_dtype) if matmul_dtype is not None else v.dtype

    tn = _pick_tile(F_out, tn_target, 128)
    tk = _pick_tile(F_in, tk_target, 128)
    N = _round_up(F_out, tn)
    K = _round_up(F_in, tk)

    # Weight-norm folded into a rank-1 scale (f32), lane-dense [1, F_out].
    vf = v.astype(jnp.float32)
    scale = (
        jnp.reshape(g, (F_out,)).astype(jnp.float32)
        * jax.lax.rsqrt(jnp.sum(vf * vf, axis=1))
    ).reshape(1, F_out)
    bias = jnp.reshape(b, (1, F_out)).astype(jnp.float32)

    w = _pad_to(v.T.astype(mm_dtype), (K, N))    # [K, N] MXU operand, zero-padded
    scale = _pad_to(scale, (1, N))
    bias = _pad_to(bias, (1, N))

    return dict(w=w, scale=scale, bias=bias, F_out=F_out, F_in=F_in,
                K=K, N=N, tn=tn, tk=tk, mm_dtype=mm_dtype)


# ---------------------------------------------------------------------------
# Per-call path (only touches x; weights come from cached params).
# ---------------------------------------------------------------------------
def norm_linear_apply(x, params, *, tm_target=512, out_dtype=None):
    B, F_in = x.shape
    assert F_in == params["F_in"], (F_in, params["F_in"])
    mm_dtype = params["mm_dtype"]
    out_dtype = jnp.dtype(out_dtype) if out_dtype is not None else x.dtype

    tn, tk, K, N = params["tn"], params["tk"], params["K"], params["N"]
    tm = _pick_tile(B, tm_target, _sublane_align(mm_dtype))
    M = _round_up(B, tm)

    # Per-row input norm, computed once (f32) in the wrapper. Costs one cheap
    # extra HBM pass over x; the kernel already re-reads x ceil(F_out/tn) times.
    xf = x.astype(jnp.float32)
    inv_xn = jax.lax.rsqrt(jnp.sum(xf * xf, axis=1, keepdims=True))   # [B, 1]
    inv_xn = _pad_to(inv_xn, (M, 1))

    xp = _pad_to(x.astype(mm_dtype), (M, K))

    grid = (M // tm, N // tn, K // tk)
    vmem_limit = _vmem_limit_bytes(tm, tn, tk,
                                   jnp.dtype(mm_dtype).itemsize,
                                   out_dtype.itemsize)

    out_padded = pl.pallas_call(
        _norm_linear_kernel,
        out_shape=jax.ShapeDtypeStruct((M, N), out_dtype),
        grid_spec=pltpu.PrefetchScalarGridSpec(
            num_scalar_prefetch=0,
            grid=grid,
            in_specs=[
                pl.BlockSpec((tm, tk), lambda i, j, k: (i, k)),   # x
                pl.BlockSpec((tk, tn), lambda i, j, k: (k, j)),   # v.T (padded)
                pl.BlockSpec((tm, 1), lambda i, j, k: (i, 0)),    # 1/||x||_row
                pl.BlockSpec((1, tn), lambda i, j, k: (0, j)),    # g/||v||_row
                pl.BlockSpec((1, tn), lambda i, j, k: (0, j)),    # bias
            ],
            out_specs=pl.BlockSpec((tm, tn), lambda i, j, k: (i, j)),
            scratch_shapes=[
                pltpu.VMEM((tm, tn), jnp.float32),   # matmul accumulator
            ],
        ),
        compiler_params=pltpu.CompilerParams(
            dimension_semantics=("parallel", "parallel", "arbitrary"),
            vmem_limit_bytes=vmem_limit,
        ),
    )(xp, params["w"], inv_xn, params["scale"], params["bias"])

    if (M, N) == (B, params["F_out"]):
        return out_padded
    return out_padded[:B, :params["F_out"]]


def norm_linear(x, v, g, b, *, tm_target=512, tn_target=1024, tk_target=512,
                matmul_dtype=None, out_dtype=None):
    """Convenience one-shot wrapper. For static weights, call
    make_norm_linear_params() once and reuse it with norm_linear_apply()."""
    params = make_norm_linear_params(v, g, b, tn_target=tn_target,
                                     tk_target=tk_target,
                                     matmul_dtype=matmul_dtype)
    return norm_linear_apply(x, params, tm_target=tm_target, out_dtype=out_dtype)


# ---------------------------------------------------------------------------
# Reference & tests
# ---------------------------------------------------------------------------
def norm_linear_ref(x, v, g, b):
    xn = x / jnp.linalg.norm(x, axis=1, keepdims=True)
    w_eff = g * v / jnp.linalg.norm(v, axis=1, keepdims=True)
    return xn @ w_eff.T + b


def _make_inputs(key, batch, in_features, out_features, dtype=jnp.float32):
    k_x, k_v, k_b = jax.random.split(key, 3)
    x = jax.random.normal(k_x, (batch, in_features), dtype=dtype)
    v = jax.random.normal(k_v, (out_features, in_features), dtype=dtype) * 0.1
    # weight_norm init: g = ||v|| per output row (so W_eff == v initially)
    g = jnp.linalg.norm(v.astype(jnp.float32), axis=1, keepdims=True).astype(dtype)
    b = jax.random.normal(k_b, (out_features,), dtype=dtype) * 0.01
    return x, v, g, b


if __name__ == "__main__":
    key = jax.random.PRNGKey(0)
    k1, k2, k3 = jax.random.split(key, 3)

    # 1) Small single-tile case (dims padded up to lane/sublane multiples).
    x, v, g, b = _make_inputs(k1, batch=8, in_features=32, out_features=16)
    out = jax.block_until_ready(norm_linear(x, v, g, b))
    ref = norm_linear_ref(x, v, g, b)
    assert out.shape == (8, 16)
    assert jnp.allclose(out, ref, atol=1e-4, rtol=1e-4), (
        f"max abs err {jnp.max(jnp.abs(out - ref))}"
    )

    # 2) Awkward (non-divisible) dims with small tile targets: exercises the
    #    full multi-tile grid, k-axis accumulation, and the padding path,
    #    plus the cached-weights apply path.
    x2, v2, g2, b2 = _make_inputs(k2, batch=24, in_features=200, out_features=272)
    params2 = make_norm_linear_params(v2, g2, b2, tn_target=128, tk_target=128)
    out2 = jax.block_until_ready(norm_linear_apply(x2, params2, tm_target=16))
    ref2 = norm_linear_ref(x2, v2, g2, b2)
    assert out2.shape == (24, 272)
    assert jnp.allclose(out2, ref2, atol=1e-4, rtol=1e-4), (
        f"max abs err {jnp.max(jnp.abs(out2 - ref2))}"
    )

    # 3) bf16 matmul operands (f32 accumulation / norms / scale+bias).
    x3, v3, g3, b3 = _make_inputs(k3, batch=32, in_features=256, out_features=384)
    out3 = jax.block_until_ready(
        norm_linear(x3, v3, g3, b3, matmul_dtype=jnp.bfloat16)
    )
    ref3 = norm_linear_ref(x3, v3, g3, b3)
    assert out3.shape == (32, 384)
    assert jnp.allclose(out3, ref3, atol=2e-2, rtol=2e-2), (
        f"max abs err {jnp.max(jnp.abs(out3 - ref3))}"
    )

    print("KERNEL_OK")
</pallas_src>

<mosaic_0001>
module attributes {stable_mosaic.version = 11 : i64} {
  func.func @_norm_linear_kernel(%arg0: i32, %arg1: i32, %arg2: i32, %arg3: memref<8x128xf32, #tpu.memory_space<vmem>>, %arg4: memref<128x128xf32, #tpu.memory_space<vmem>>, %arg5: memref<8x1xf32, #tpu.memory_space<vmem>>, %arg6: memref<1x128xf32, #tpu.memory_space<vmem>>, %arg7: memref<1x128xf32, #tpu.memory_space<vmem>>, %arg8: memref<8x128xf32, #tpu.memory_space<vmem>>, %arg9: memref<8x128xf32, #tpu.memory_space<vmem>>) attributes {dimension_semantics = [#tpu.dimension_semantics<parallel>, #tpu.dimension_semantics<parallel>, #tpu.dimension_semantics<arbitrary>], iteration_bounds = array<i64: 1, 1, 1>, scalar_prefetch = 0 : i64, scratch_operands = 1 : i64, tpu.core_type = #tpu.core_type<tc>, window_params = [{transform_indices = @transform_0, window_bounds = array<i64: 8, 128>}, {transform_indices = @transform_1, window_bounds = array<i64: 128, 128>}, {transform_indices = @transform_2, window_bounds = array<i64: 8, 1>}, {transform_indices = @transform_3, window_bounds = array<i64: 1, 128>}, {transform_indices = @transform_4, window_bounds = array<i64: 1, 128>}, {transform_indices = @transform_5, window_bounds = array<i64: 8, 128>}]} {
    %c0_i32 = arith.constant 0 : i32
    %0 = arith.cmpi eq, %arg2, %c0_i32 : i32
    %1 = arith.extui %0 : i1 to i32
    %c0_i32_0 = arith.constant 0 : i32
    %2 = arith.cmpi ne, %1, %c0_i32_0 : i32
    scf.if %2 {
      %cst_10 = arith.constant 0.000000e+00 : f32
      %12 = vector.broadcast %cst_10 : f32 to vector<8x128xf32>
      %c0_11 = arith.constant 0 : index
      %c0_12 = arith.constant 0 : index
      %13 = vector.load %arg9[%c0_11, %c0_12] : memref<8x128xf32, #tpu.memory_space<vmem>>, vector<8x128xf32>
      tpu.vector_store %arg9[%c0_11, %c0_12], %12 {strides = array<i32>} : memref<8x128xf32, #tpu.memory_space<vmem>>, vector<8x128xf32>,
    } else {
    }
    %c0 = arith.constant 0 : index
    %c0_1 = arith.constant 0 : index
    %3 = vector.load %arg9[%c0, %c0_1] : memref<8x128xf32, #tpu.memory_space<vmem>>, vector<8x128xf32>
    %c0_2 = arith.constant 0 : index
    %c0_3 = arith.constant 0 : index
    %4 = vector.load %arg3[%c0_2, %c0_3] : memref<8x128xf32, #tpu.memory_space<vmem>>, vector<8x128xf32>
    %c0_4 = arith.constant 0 : index
    %c0_5 = arith.constant 0 : index
    %5 = vector.load %arg4[%c0_4, %c0_5] : memref<128x128xf32, #tpu.memory_space<vmem>>, vector<128x128xf32>
    %cst = arith.constant dense<0.000000e+00> : vector<8x128xf32>
    %6 = tpu.matmul %4, %5, %cst {dimension_numbers = #tpu.dot_dimension_numbers<[1], [0], [0], [1], [0, 0, 1, 1], [], []>} : vector<8x128xf32>, vector<128x128xf32>, vector<8x128xf32> -> vector<8x128xf32>
    %7 = arith.addf %3, %6 : vector<8x128xf32>
    %c0_6 = arith.constant 0 : index
    %c0_7 = arith.constant 0 : index
    %8 = vector.load %arg9[%c0_6, %c0_7] : memref<8x128xf32, #tpu.memory_space<vmem>>, vector<8x128xf32>
    tpu.vector_store %arg9[%c0_6, %c0_7], %7 {strides = array<i32>} : memref<8x128xf32, #tpu.memory_space<vmem>>, vector<8x128xf32>,
    %c0_i32_8 = arith.constant 0 : i32
    %9 = arith.cmpi eq, %arg2, %c0_i32_8 : i32
    %10 = arith.extui %9 : i1 to i32
    %c0_i32_9 = arith.constant 0 : i32
    %11 = arith.cmpi ne, %10, %c0_i32_9 : i32
    scf.if %11 {
      %c0_10 = arith.constant 0 : index
      %c0_11 = arith.constant 0 : index
      %12 = vector.load %arg5[%c0_10, %c0_11] : memref<8x1xf32, #tpu.memory_space<vmem>>, vector<8x1xf32>
      %c0_12 = arith.constant 0 : index
      %c0_13 = arith.constant 0 : index
      %13 = vector.load %arg6[%c0_12, %c0_13] : memref<1x128xf32, #tpu.memory_space<vmem>>, vector<1x128xf32>
      %c0_14 = arith.constant 0 : index
      %c0_15 = arith.constant 0 : index
      %14 = vector.load %arg7[%c0_14, %c0_15] : memref<1x128xf32, #tpu.memory_space<vmem>>, vector<1x128xf32>
      %c0_16 = arith.constant 0 : index
      %c0_17 = arith.constant 0 : index
      %15 = vector.load %arg9[%c0_16, %c0_17] : memref<8x128xf32, #tpu.memory_space<vmem>>, vector<8x128xf32>
      %16 = vector.broadcast %12 : vector<8x1xf32> to vector<8x128xf32>
      %17 = arith.mulf %15, %16 : vector<8x128xf32>
      %18 = vector.broadcast %13 : vector<1x128xf32> to vector<8x128xf32>
      %19 = arith.mulf %17, %18 : vector<8x128xf32>
      %20 = vector.broadcast %14 : vector<1x128xf32> to vector<8x128xf32>
      %21 = arith.addf %19, %20 : vector<8x128xf32>
      %c0_18 = arith.constant 0 : index
      %c0_19 = arith.constant 0 : index
      %22 = vector.load %arg8[%c0_18, %c0_19] : memref<8x128xf32, #tpu.memory_space<vmem>>, vector<8x128xf32>
      tpu.vector_store %arg8[%c0_18, %c0_19], %21 {strides = array<i32>} : memref<8x128xf32, #tpu.memory_space<vmem>>, vector<8x128xf32>,
    } else {
    }
    return
  }
  func.func @transform_0(%arg0: i32, %arg1: i32, %arg2: i32) -> (i32, i32) {
    %c0_i32 = arith.constant 0 : i32
    return %arg0, %arg2 : i32, i32
  }
  func.func @transform_1(%arg0: i32, %arg1: i32, %arg2: i32) -> (i32, i32) {
    %c0_i32 = arith.constant 0 : i32
    return %arg2, %arg1 : i32, i32
  }
  func.func @transform_2(%arg0: i32, %arg1: i32, %arg2: i32) -> (i32, i32) {
    %c0_i32 = arith.constant 0 : i32
    %c0_i32_0 = arith.constant 0 : i32
    return %arg0, %c0_i32 : i32, i32
  }
  func.func @transform_3(%arg0: i32, %arg1: i32, %arg2: i32) -> (i32, i32) {
    %c0_i32 = arith.constant 0 : i32
    %c0_i32_0 = arith.constant 0 : i32
    return %c0_i32, %arg1 : i32, i32
  }
  func.func @transform_4(%arg0: i32, %arg1: i32, %arg2: i32) -> (i32, i32) {
    %c0_i32 = arith.constant 0 : i32
    %c0_i32_0 = arith.constant 0 : i32
    return %c0_i32, %arg1 : i32, i32
  }
  func.func @transform_5(%arg0: i32, %arg1: i32, %arg2: i32) -> (i32, i32) {
    %c0_i32 = arith.constant 0 : i32
    return %arg0, %arg1 : i32, i32
  }
}

</mosaic_0001>

<bundles_post_ra>
// kernel: tpu_custom_call.1
= control target key start
LH: loop header
LB: loop body
LE: loop exit
PB: predicated region body
PF: predicated region fallthrough
CT: control target
= control target key end

     0   :  { %10 = vsyncpa [#allocation4], 0  ;;  %s382_s0 = inlined_call_operand.vmem [shape: f32[8,128], index: 0, kind: input, shape index: {}]   ;;  %s383_s1 = inlined_call_operand.hbm [shape: f32[128,128], index: 1, kind: input, shape index: {}]   ;;  %s384_s2 = inlined_call_operand.vmem [shape: f32[8,1], index: 2, kind: input, shape index: {}]   ;;  %s385_s3 = inlined_call_operand.vmem [shape: f32[1,128], index: 3, kind: input, shape index: {}]   ;;  %s386_s4 = inlined_call_operand.vmem [shape: f32[1,128], index: 4, kind: input, shape index: {}]   ;;  %s387_s5 = inlined_call_operand.hbm [shape: f32[8,128], index: 5, kind: output, shape index: {}]  }
   0x1   :  { %11 = vsyncpa [#allocation5], 0  ;;  %s308_s18 = smov [#allocation3]   ;;  %s260_s22 = scalar_lea.hbm %s383_s1, 2048 }
   0x2   :  { %s19_s19 = sshll.u32 %s308_s18, 4  ;;  %p261_p0 = scmp.ne.s32.totalorder %s383_s1, %s260_s22  ;;  %s20_s19 = int_to_ptr.vmem [resolvable:$true] %s19_s19 }
   0x3   :  { %p264_p1 = scmp.lt.u32.totalorder %s260_s22, %s383_s1 }
   0x5   :  { %p266_p2 = pnand %p264_p1, %p261_p0 }
   0x7   :  { %269 = shalt.err (!%p266_p2)
}
   0x8   :  { %s270_s27 = scalar_lea.vmem %s20_s19, 2048  ;;  %p275_p4 = scmp.lt.s32.totalorder %s20_s19, %s20_s19 }
   0x9   :  { %p271_p3 = scmp.ne.s32.totalorder %s20_s19, %s270_s27  ;;  %p276_p5 = scmp.lt.s32.totalorder %s270_s27, %s270_s27 }
   0xb   :  { %p277_p6 = por %p276_p5, %p275_p4 }
   0xd   :  { %p278_p7 = pnand %p277_p6, %p271_p3 }
   0xf   :  { %281 = shalt.err (!%p278_p7)
}
  0x10   :  { %s309_s28 = smov 128   ;;  %s310_s29 = smov 8  }
  0x11   :  { %25 = dma.hbm_to_vmem [thread:$0]  %s383_s1, 2048, %s20_s19, [#allocation4], %s309_s28, %s309_s28, %s310_s29  }
  0x12   :  { %304 = dma.done.wait [#allocation4], 2048  }
  0x13   :  { %305 = vsyncadd [#allocation4], 4294965248  ;;  %v311_v0 = vmov 0.0|0.0   ;;  %vm312_vm0 = vmmov 0   ;;  %v313_v1 = vmov 0.0   ;;  %v314_v2 = vmov 0  }
  0x14   :  { %227 = vmatprep.subr.bf16.mxu0 %v311_v0  ;;  %224 = vmatprep.mubr.msk.f32.mxu0 %vm312_vm0, %v313_v1  ;;  %v42_v3 = vld [vmem:[#allocation3] sm:$0xff]  ;;  %v43_v4 = vld [vmem:[#allocation3 + $0x8] sm:$0xff]  ;;  %v44_v5 = vld [vmem:[#allocation3 + $0x10] sm:$0xff]  ;;  %s315_s13 = smov [#allocation6]  }
  0x15   :  { %259 = vset.pattern.permute.xlu0 %v314_v2  ;;  %v228_v6 = vpack.c.bf16 %v43_v4, %v42_v3  ;;  %v45_v7 = vld [vmem:[#allocation3 + $0x18] sm:$0xff]  ;;  %v46_v9 = vld [vmem:[#allocation3 + $0x20] sm:$0xff]  ;;  %v47_v10 = vld [vmem:[#allocation3 + $0x28] sm:$0xff]  ;;  %s164_s14 = sshll.u32 %s315_s13, 4  ;;  %s165_s14 = int_to_ptr.vmem [resolvable:$true] %s164_s14 }
  0x16   :  { %v231_v8 = vpack.c.bf16 %v45_v7, %v44_v5  ;;  %v133_v11 = vld [vmem:[%s384_s2] sm:$0xff]  ;;  %v234_v12 = vpack.c.bf16 %v47_v10, %v46_v9  ;;  %v48_v13 = vld [vmem:[#allocation3 + $0x30] sm:$0xff]  ;;  %v49_v14 = vld [vmem:[#allocation3 + $0x38] sm:$0xff]  ;;  %p287_p9 = scmp.lt.s32.totalorder %s165_s14, %s165_s14 }
  0x17   :  { %229 = vmatpush3.bf16.msra.mxu0 %v228_v6  ;;  %139 = vperm.xlu0 %259, %v133_v11   ;;  %v237_v15 = vpack.c.bf16 %v49_v14, %v48_v13  ;;  %v50_v16 = vld [vmem:[#allocation3 + $0x40] sm:$0xff]  ;;  %v51_v17 = vld [vmem:[#allocation3 + $0x48] sm:$0xff]  ;;  %v52_v19 = vld [vmem:[#allocation3 + $0x50] sm:$0xff] }
  0x18   :  { %230 = vmatprep.subr.bf16.mxu0 %v311_v0  ;;  %v240_v18 = vpack.c.bf16 %v51_v17, %v50_v16  ;;  %v53_v20 = vld [vmem:[#allocation3 + $0x58] sm:$0xff]  ;;  %v54_v22 = vld [vmem:[#allocation3 + $0x60] sm:$0xff]  ;;  %v55_v23 = vld [vmem:[#allocation3 + $0x68] sm:$0xff] }
  0x19   :  { %v243_v21 = vpack.c.bf16 %v53_v20, %v52_v19  ;;  %v246_v24 = vpack.c.bf16 %v55_v23, %v54_v22  ;;  %v56_v25 = vld [vmem:[#allocation3 + $0x70] sm:$0xff]  ;;  %v57_v26 = vld [vmem:[#allocation3 + $0x78] sm:$0xff]  ;;  %v41_v28 = vld [vmem:[%s382_s0] sm:$0xff]  ;;  %s282_s0 = scalar_lea.vmem %s165_s14, 128 }
  0x1a   :  { %v249_v27 = vpack.c.bf16 %v57_v26, %v56_v25  ;;  %v173_v31 = vld [vmem:[%s385_s3] ss:$0 sm:$0xff]  ;;  %p283_p8 = scmp.ne.s32.totalorder %s165_s14, %s282_s0  ;;  %p288_p10 = scmp.lt.s32.totalorder %s282_s0, %s282_s0 }
  0x1b   :  { %232 = vmatpush3.bf16.msra.mxu0 %v231_v8  ;;  %v174_v34 = vld [vmem:[%s386_s4] ss:$0 sm:$0xff] }
  0x1c   :  { %233 = vmatprep.subr.bf16.mxu0 %v311_v0  ;;  %p289_p11 = por %p288_p10, %p287_p9 }
  0x1e   :  { %p290_p12 = pnand %p289_p11, %p283_p8 }
  0x1f   :  { %235 = vmatpush3.bf16.msra.mxu0 %v234_v12 }
  0x20   :  { %236 = vmatprep.subr.bf16.mxu0 %v311_v0 }
  0x23   :  { %238 = vmatpush3.bf16.msra.mxu0 %v237_v15 }
  0x24   :  { %239 = vmatprep.subr.bf16.mxu0 %v311_v0 }
  0x27   :  { %241 = vmatpush3.bf16.msra.mxu0 %v240_v18 }
  0x28   :  { %242 = vmatprep.subr.bf16.mxu0 %v311_v0 }
  0x2b   :  { %244 = vmatpush3.bf16.msra.mxu0 %v243_v21 }
  0x2c   :  { %245 = vmatprep.subr.bf16.mxu0 %v311_v0 }
  0x2f   :  { %247 = vmatpush3.bf16.msra.mxu0 %v246_v24 }
  0x30   :  { %248 = vmatprep.subr.bf16.mxu0 %v311_v0 }
  0x33   :  { %250 = vmatpush3.bf16.msra.mxu0 %v249_v27 }
  0x36   :  { %225 = vmatmul.mubr.f32.vlgmr.msra.gmra.mrb[0].mxu0 %v41_v28 }
  0x96   :  { %v140_v29 = vpop.permute.xlu0 %139 }
 0x109   :  { %v124_v30 = vpop.f32.mrb[0].mxu0 }
 0x10a   :  { %v142_v32 = vmul.f32 %v140_v29, %v124_v30  ;;  %v226_v33 = vpop.f32.mrb[1].mxu0 }
 0x10c   :  { %v149_v35 = vmul.f32 %v173_v31, %v142_v32 }
 0x10e   :  { %v156_v36 = vadd.f32 %v174_v34, %v149_v35 }
 0x110   :  { %157 = vst [vmem:[#allocation6] sm:$0xff] %v156_v36 }
 0x111   :  { %293 = shalt.err (!%p290_p12)
}
 0x112   :  { %s294_s16 = scalar_lea.hbm %s387_s5, 128 }
 0x113   :  { %p295_p13 = scmp.ne.s32.totalorder %s387_s5, %s294_s16  ;;  %p298_p0 = scmp.lt.u32.totalorder %s294_s16, %s387_s5 }
 0x115   :  { %p300_p1 = pnand %p298_p0, %p295_p13 }
 0x117   :  { %303 = shalt.err (!%p300_p1)
}
 0x118   :  { %167 = dma.vmem_to_hbm [thread:$0]  %s165_s14, 128, %s387_s5, [#allocation5]  }
 0x119   :  { %306 = dma.done.wait [#allocation5], 128  }
 0x11a   :  { %307 = vsyncadd [#allocation5], 4294967168 }
 0x11b   :  { %171 = vsyncpa [#allocation4], 1 }
 0x11c   :  { %172 = vsyncpa [#allocation5], 1 }

</bundles_post_ra>
